<compile_context>
chip_gen: v7x
topology: tpu7x:2x2x1
jax: 0.10.0
libtpu: 0.0.40
codegen_flags: <defaults>
</compile_context>

<pallas_src>
import functools

import jax
import jax.numpy as jnp
from jax import lax
from jax.experimental import pallas as pl
from jax.experimental.pallas import tpu as pltpu


def _round_up(x, m):
    return ((x + m - 1) // m) * m


def _temporal_mask_kernel(lens_ref,   # (B,) int32 in SMEM (scalar prefetch)
                          x_ref,      # (GB, TS, L) input dtype
                          w1_ref,     # (L, P*H)   block-diagonal Linear(2H->H), x dtype
                          b1_ref,     # (1, P*H)   f32
                          w2_ref,     # (P*H, L)   slot-expanded Linear(H->1), f32
                          b2_ref,     # (1,)       f32 scalar in SMEM
                          o_ref,      # (GB, TS, L) input dtype
                          *, P, Dp):
    GB, TS, L = x_ref.shape
    i = pl.program_id(0)              # batch-group index
    j = pl.program_id(1)              # packed-row chunk within a batch

    # Hoisted once per block: weights + iotas.
    w1 = w1_ref[...]
    b1 = b1_ref[...]
    w2 = w2_ref[...]
    b2 = b2_ref[0]
    lane = lax.broadcasted_iota(jnp.int32, (TS, L), 1)   # lane id 0..L-1
    srow = lax.broadcasted_iota(jnp.int32, (TS, L), 0)   # packed-row id within block
    p0 = j * TS

    def process(g):
        xg = x_ref[g]                                               # (TS, L)
        # Fused Linear(2H->H) for all P packed timesteps: one MXU matmul.
        h = jnp.dot(xg, w1, preferred_element_type=jnp.float32) + b1
        h = jnp.maximum(h, 0.0)                                     # ReLU (VPU)
        # Fused Linear(H->1) + slot->lane expansion: second MXU matmul.
        logits = jnp.dot(h, w2, preferred_element_type=jnp.float32) + b2
        m = jax.nn.sigmoid(logits)                                  # (TS, L), EUP
        # Length mask: lane c of packed row (p0+s) holds timestep P*(p0+s) + c//Dp,
        # valid iff that timestep < lengths[b]  <=>  c < Dp*(len_b - P*(p0+s)).
        len_b = lens_ref[i * GB + g]                                # scalar SMEM read
        thresh = Dp * (len_b - P * (p0 + srow))
        m = jnp.where(lane < thresh, m, 0.0)
        # Only the final multiply runs in f32; store is lane-dense (L % 128 == 0).
        o_ref[g] = (xg.astype(jnp.float32) * m).astype(o_ref.dtype)

    if GB <= 8:
        for g in range(GB):                                         # small, unrolled
            process(g)
    else:
        def body(g, carry):
            process(g)
            return carry
        lax.fori_loop(0, GB, body, 0)


def bilstm_temporal_masking(bilstm_output, lengths, params, *, target_block_bytes=4 << 20):
    """bilstm_output: [B, S, 2*hidden]; lengths: [B] int or None. Returns [B, S, 2*hidden]."""
    B, S, D = bilstm_output.shape
    H = params["w1"].shape[1]
    out_dtype = bilstm_output.dtype
    itemsize = jnp.dtype(out_dtype).itemsize

    # ---- lane-dense packing geometry --------------------------------------
    if D <= 128 and 128 % D == 0:
        P, Dp = 128 // D, D                 # pack P consecutive timesteps per 128 lanes
    else:
        P, Dp = 1, _round_up(D, 128)        # zero-pad features so stores stay lane-dense
    L = P * Dp
    S_pad = _round_up(S, P)
    SP = S_pad // P                         # packed rows per batch element

    if lengths is None:
        lengths = jnp.full((B,), S, dtype=jnp.int32)
    lengths = lengths.astype(jnp.int32)

    x = bilstm_output
    if S_pad != S or Dp != D:               # uncommon path; costs one materialized pad
        x = jnp.pad(x, ((0, 0), (0, S_pad - S), (0, Dp - D)))
    x3 = x.reshape(B, SP, L)                # pure row-major reshape (free)

    # ---- block geometry -----------------------------------------------------
    sub = 16 if itemsize == 2 else 8        # sublane granule (bf16 tiles are (16,128))
    per_batch_bytes = SP * L * itemsize
    if per_batch_bytes <= target_block_bytes:
        # Group GB whole batch elements per block (GB | B -> no batch padding/copies).
        gb_cap = int(max(1, min(B, target_block_bytes // max(per_batch_bytes, 1), 64)))
        if B > 1 and B * per_batch_bytes >= (2 << 20):
            gb_cap = max(1, min(gb_cap, B // 2))    # keep >=2 blocks for megacore
        GB = max(g for g in range(1, gb_cap + 1) if B % g == 0)
        TS, nJ = SP, 1
    else:
        # Long sequences: one batch per block, split the packed-row axis.
        GB = 1
        nJ = -(-per_batch_bytes // target_block_bytes)
        TS = _round_up(-(-SP // nJ), sub)
        nJ = -(-SP // TS)
        if nJ * TS != SP:
            x3 = jnp.pad(x3, ((0, 0), (0, nJ * TS - SP), (0, 0)))
    nB = B // GB
    SPt = nJ * TS

    # ---- fused mask-network parameters (Linear weights stored [in, out]) ----
    w1 = params["w1"].astype(jnp.float32).reshape(D, H)
    b1 = params["b1"].astype(jnp.float32).reshape(H)
    w2 = params["w2"].astype(jnp.float32).reshape(H, 1)
    b2 = params["b2"].astype(jnp.float32).reshape(1)
    PH = P * H
    w1blk = jnp.zeros((L, PH), jnp.float32)           # block-diagonal Linear(2H->H)
    w2exp = jnp.zeros((PH, L), jnp.float32)           # slot-expanded Linear(H->1)
    for s in range(P):
        w1blk = w1blk.at[s * Dp:s * Dp + D, s * H:(s + 1) * H].set(w1)
        w2exp = w2exp.at[s * H:(s + 1) * H, s * Dp:(s + 1) * Dp].set(
            jnp.broadcast_to(w2, (H, Dp)))
    w1blk = w1blk.astype(out_dtype)                   # feed the MXU in the input dtype
    b1t = jnp.tile(b1.reshape(1, H), (1, P))          # (1, PH)

    # ---- cost / VMEM sizing --------------------------------------------------
    rows_total = B * SPt
    block_bytes = GB * TS * L * itemsize
    cost = pl.CostEstimate(
        flops=int(rows_total * (4 * L * PH + 8 * L)),
        transcendentals=int(rows_total * L),
        bytes_accessed=int(2 * rows_total * L * itemsize + (2 * L * PH + PH) * 4 + B * 4),
    )
    vmem_est = 4 * block_bytes + 5 * TS * L * 4 + 2 * L * PH * 4 + (1 << 20)
    vmem_limit = int(min(48 << 20, max(24 << 20, 2 * vmem_est)))

    kernel = functools.partial(_temporal_mask_kernel, P=P, Dp=Dp)

    out3 = pl.pallas_call(
        kernel,
        out_shape=jax.ShapeDtypeStruct((B, SPt, L), out_dtype),
        grid_spec=pltpu.PrefetchScalarGridSpec(
            num_scalar_prefetch=1,                               # lengths -> SMEM
            grid=(nB, nJ),
            in_specs=[
                pl.BlockSpec((GB, TS, L), lambda i, j, lens: (i, j, 0)),   # activations
                pl.BlockSpec((L, PH), lambda i, j, lens: (0, 0)),          # W1 block-diag
                pl.BlockSpec((1, PH), lambda i, j, lens: (0, 0)),          # b1 (tiled)
                pl.BlockSpec((PH, L), lambda i, j, lens: (0, 0)),          # W2 expanded
                pl.BlockSpec(memory_space=pltpu.MemorySpace.SMEM),         # b2 scalar
            ],
            out_specs=pl.BlockSpec((GB, TS, L), lambda i, j, lens: (i, j, 0)),
        ),
        compiler_params=pltpu.CompilerParams(
            dimension_semantics=("parallel", "parallel"),
            vmem_limit_bytes=vmem_limit,
        ),
        cost_estimate=cost,
    )(lengths, x3, w1blk, b1t, w2exp, b2)

    return out3[:, :SP, :].reshape(B, S_pad, Dp)[:, :S, :D]


def _reference(bilstm_output, lengths, params):
    x = bilstm_output.astype(jnp.float32)
    h = jnp.maximum(x @ params["w1"].astype(jnp.float32) + params["b1"].astype(jnp.float32), 0.0)
    m = jax.nn.sigmoid(h @ params["w2"].astype(jnp.float32) + params["b2"].astype(jnp.float32))
    if lengths is not None:
        B, S = x.shape[:2]
        lm = (jnp.arange(S)[None, :] < lengths[:, None]).astype(jnp.float32)
        m = m * lm[:, :, None]
    return (x * m).astype(bilstm_output.dtype)


if __name__ == "__main__":
    # Module config: hidden_dim=32 -> feature dim D = 2*hidden = 64 (packs 2 steps/row).
    batch, seq, hidden = 2, 8, 32
    D = 2 * hidden

    key = jax.random.PRNGKey(0)
    kx, k1, k2, k3, k4 = jax.random.split(key, 5)

    bilstm_output = jax.random.normal(kx, (batch, seq, D), dtype=jnp.float32)
    lengths = jnp.array([seq, seq - 3], dtype=jnp.int32)

    # Deterministic parameter init (Linear weights stored as [in, out]).
    params = {
        "w1": jax.random.normal(k1, (D, hidden), dtype=jnp.float32) * 0.1,
        "b1": jax.random.normal(k2, (hidden,), dtype=jnp.float32) * 0.1,
        "w2": jax.random.normal(k3, (hidden, 1), dtype=jnp.float32) * 0.1,
        "b2": jax.random.normal(k4, (1,), dtype=jnp.float32) * 0.1,
    }

    out = bilstm_temporal_masking(bilstm_output, lengths, params)
    out = jax.block_until_ready(out)

    ref = _reference(bilstm_output, lengths, params)
    assert out.shape == (batch, seq, D)
    assert jnp.allclose(out, ref, atol=1e-4, rtol=1e-4), "mismatch vs reference"

    print("KERNEL_OK")
</pallas_src>

<mosaic_0001>
module attributes {stable_mosaic.version = 11 : i64} {
  func.func @_temporal_mask_kernel(%arg0: i32, %arg1: i32, %arg2: memref<2xi32, #tpu.memory_space<smem>>, %arg3: memref<2x4x128xf32, #tpu.memory_space<vmem>>, %arg4: memref<128x64xf32, #tpu.memory_space<vmem>>, %arg5: memref<1x64xf32, #tpu.memory_space<vmem>>, %arg6: memref<64x128xf32, #tpu.memory_space<vmem>>, %arg7: memref<1xf32, #tpu.memory_space<smem>>, %arg8: memref<2x4x128xf32, #tpu.memory_space<vmem>>) attributes {dimension_semantics = [#tpu.dimension_semantics<parallel>, #tpu.dimension_semantics<parallel>], iteration_bounds = array<i64: 1, 1>, scalar_prefetch = 1 : i64, scratch_operands = 0 : i64, tpu.core_type = #tpu.core_type<tc>, window_params = [{transform_indices = @transform_0, window_bounds = array<i64: 2, 4, 128>}, {pipeline_mode = #tpu.pipeline_mode<synchronous>, transform_indices = @transform_1, window_bounds = array<i64: 128, 64>}, {pipeline_mode = #tpu.pipeline_mode<synchronous>, transform_indices = @transform_2, window_bounds = array<i64: 1, 64>}, {pipeline_mode = #tpu.pipeline_mode<synchronous>, transform_indices = @transform_3, window_bounds = array<i64: 64, 128>}, {transform_indices = @transform_4, window_bounds = array<i64: 1>}, {transform_indices = @transform_5, window_bounds = array<i64: 2, 4, 128>}]} {
    %c0 = arith.constant 0 : index
    %c0_0 = arith.constant 0 : index
    %0 = vector.load %arg4[%c0, %c0_0] : memref<128x64xf32, #tpu.memory_space<vmem>>, vector<128x64xf32>
    %c0_1 = arith.constant 0 : index
    %c0_2 = arith.constant 0 : index
    %1 = vector.load %arg5[%c0_1, %c0_2] : memref<1x64xf32, #tpu.memory_space<vmem>>, vector<1x64xf32>
    %c0_3 = arith.constant 0 : index
    %c0_4 = arith.constant 0 : index
    %2 = vector.load %arg6[%c0_3, %c0_4] : memref<64x128xf32, #tpu.memory_space<vmem>>, vector<64x128xf32>
    %c0_5 = arith.constant 0 : index
    %3 = memref.load %arg7[%c0_5] : memref<1xf32, #tpu.memory_space<smem>>
    %4 = tpu.iota {dimensions = array<i32: 1>} : vector<4x128xi32>
    %5 = tpu.iota {dimensions = array<i32: 0>} : vector<4x128xi32>
    %c4_i32 = arith.constant 4 : i32
    %6 = arith.muli %arg1, %c4_i32 : i32
    %c0_6 = arith.constant 0 : index
    %c0_7 = arith.constant 0 : index
    %c0_8 = arith.constant 0 : index
    %7 = vector.load %arg3[%c0_6, %c0_7, %c0_8] : memref<2x4x128xf32, #tpu.memory_space<vmem>>, vector<1x4x128xf32>
    %8 = vector.shape_cast %7 : vector<1x4x128xf32> to vector<4x128xf32>
    %cst = arith.constant dense<0.000000e+00> : vector<4x64xf32>
    %9 = tpu.matmul %8, %0, %cst {dimension_numbers = #tpu.dot_dimension_numbers<[1], [0], [0], [1], [0, 0, 1, 1], [], []>} : vector<4x128xf32>, vector<128x64xf32>, vector<4x64xf32> -> vector<4x64xf32>
    %10 = vector.broadcast %1 : vector<1x64xf32> to vector<4x64xf32>
    %11 = arith.addf %9, %10 : vector<4x64xf32>
    %cst_9 = arith.constant 0.000000e+00 : f32
    %12 = vector.broadcast %cst_9 : f32 to vector<4x64xf32>
    %13 = arith.maximumf %11, %12 : vector<4x64xf32>
    %cst_10 = arith.constant dense<0.000000e+00> : vector<4x128xf32>
    %14 = tpu.matmul %13, %2, %cst_10 {dimension_numbers = #tpu.dot_dimension_numbers<[1], [0], [0], [1], [0, 0, 1, 1], [], []>} : vector<4x64xf32>, vector<64x128xf32>, vector<4x128xf32> -> vector<4x128xf32>
    %15 = vector.broadcast %3 : f32 to vector<4x128xf32>
    %16 = arith.addf %14, %15 : vector<4x128xf32>
    %17 = arith.negf %16 : vector<4x128xf32>
    %18 = math.exp %17 : vector<4x128xf32>
    %cst_11 = arith.constant 1.000000e+00 : f32
    %19 = vector.broadcast %cst_11 : f32 to vector<4x128xf32>
    %20 = arith.addf %19, %18 : vector<4x128xf32>
    %21 = arith.divf %19, %20 : vector<4x128xf32>
    %c2_i32 = arith.constant 2 : i32
    %22 = arith.muli %arg0, %c2_i32 : i32
    %c0_i32 = arith.constant 0 : i32
    %23 = arith.addi %22, %c0_i32 : i32
    %24 = arith.index_cast %23 : i32 to index
    %25 = memref.load %arg2[%24] : memref<2xi32, #tpu.memory_space<smem>>
    %26 = vector.broadcast %6 : i32 to vector<4x128xi32>
    %27 = arith.addi %26, %5 : vector<4x128xi32>
    %c2_i32_12 = arith.constant 2 : i32
    %28 = vector.broadcast %c2_i32_12 : i32 to vector<4x128xi32>
    %29 = arith.muli %28, %27 : vector<4x128xi32>
    %30 = vector.broadcast %25 : i32 to vector<4x128xi32>
    %31 = arith.subi %30, %29 : vector<4x128xi32>
    %c64_i32 = arith.constant 64 : i32
    %32 = vector.broadcast %c64_i32 : i32 to vector<4x128xi32>
    %33 = arith.muli %32, %31 : vector<4x128xi32>
    %34 = arith.cmpi slt, %4, %33 : vector<4x128xi32>
    %cst_13 = arith.constant 0.000000e+00 : f32
    %35 = vector.broadcast %cst_13 : f32 to vector<4x128xf32>
    %36 = arith.select %34, %21, %35 : vector<4x128xi1>, vector<4x128xf32>
    %37 = arith.mulf %8, %36 : vector<4x128xf32>
    %c0_14 = arith.constant 0 : index
    %c0_15 = arith.constant 0 : index
    %c0_16 = arith.constant 0 : index
    %38 = vector.load %arg8[%c0_14, %c0_15, %c0_16] : memref<2x4x128xf32, #tpu.memory_space<vmem>>, vector<1x4x128xf32>
    %39 = vector.shape_cast %38 : vector<1x4x128xf32> to vector<4x128xf32>
    %40 = vector.shape_cast %37 : vector<4x128xf32> to vector<1x4x128xf32>
    tpu.vector_store %arg8[%c0_14, %c0_15, %c0_16], %40 {strides = array<i32>} : memref<2x4x128xf32, #tpu.memory_space<vmem>>, vector<1x4x128xf32>,
    %c1 = arith.constant 1 : index
    %c0_17 = arith.constant 0 : index
    %c0_18 = arith.constant 0 : index
    %41 = vector.load %arg3[%c1, %c0_17, %c0_18] : memref<2x4x128xf32, #tpu.memory_space<vmem>>, vector<1x4x128xf32>
    %42 = vector.shape_cast %41 : vector<1x4x128xf32> to vector<4x128xf32>
    %cst_19 = arith.constant dense<0.000000e+00> : vector<4x64xf32>
    %43 = tpu.matmul %42, %0, %cst_19 {dimension_numbers = #tpu.dot_dimension_numbers<[1], [0], [0], [1], [0, 0, 1, 1], [], []>} : vector<4x128xf32>, vector<128x64xf32>, vector<4x64xf32> -> vector<4x64xf32>
    %44 = vector.broadcast %1 : vector<1x64xf32> to vector<4x64xf32>
    %45 = arith.addf %43, %44 : vector<4x64xf32>
    %cst_20 = arith.constant 0.000000e+00 : f32
    %46 = vector.broadcast %cst_20 : f32 to vector<4x64xf32>
    %47 = arith.maximumf %45, %46 : vector<4x64xf32>
    %cst_21 = arith.constant dense<0.000000e+00> : vector<4x128xf32>
    %48 = tpu.matmul %47, %2, %cst_21 {dimension_numbers = #tpu.dot_dimension_numbers<[1], [0], [0], [1], [0, 0, 1, 1], [], []>} : vector<4x64xf32>, vector<64x128xf32>, vector<4x128xf32> -> vector<4x128xf32>
    %49 = vector.broadcast %3 : f32 to vector<4x128xf32>
    %50 = arith.addf %48, %49 : vector<4x128xf32>
    %51 = arith.negf %50 : vector<4x128xf32>
    %52 = math.exp %51 : vector<4x128xf32>
    %cst_22 = arith.constant 1.000000e+00 : f32
    %53 = vector.broadcast %cst_22 : f32 to vector<4x128xf32>
    %54 = arith.addf %53, %52 : vector<4x128xf32>
    %55 = arith.divf %53, %54 : vector<4x128xf32>
    %c2_i32_23 = arith.constant 2 : i32
    %56 = arith.muli %arg0, %c2_i32_23 : i32
    %c1_i32 = arith.constant 1 : i32
    %57 = arith.addi %56, %c1_i32 : i32
    %58 = arith.index_cast %57 : i32 to index
    %59 = memref.load %arg2[%58] : memref<2xi32, #tpu.memory_space<smem>>
    %60 = vector.broadcast %6 : i32 to vector<4x128xi32>
    %61 = arith.addi %60, %5 : vector<4x128xi32>
    %c2_i32_24 = arith.constant 2 : i32
    %62 = vector.broadcast %c2_i32_24 : i32 to vector<4x128xi32>
    %63 = arith.muli %62, %61 : vector<4x128xi32>
    %64 = vector.broadcast %59 : i32 to vector<4x128xi32>
    %65 = arith.subi %64, %63 : vector<4x128xi32>
    %c64_i32_25 = arith.constant 64 : i32
    %66 = vector.broadcast %c64_i32_25 : i32 to vector<4x128xi32>
    %67 = arith.muli %66, %65 : vector<4x128xi32>
    %68 = arith.cmpi slt, %4, %67 : vector<4x128xi32>
    %cst_26 = arith.constant 0.000000e+00 : f32
    %69 = vector.broadcast %cst_26 : f32 to vector<4x128xf32>
    %70 = arith.select %68, %55, %69 : vector<4x128xi1>, vector<4x128xf32>
    %71 = arith.mulf %42, %70 : vector<4x128xf32>
    %c1_27 = arith.constant 1 : index
    %c0_28 = arith.constant 0 : index
    %c0_29 = arith.constant 0 : index
    %72 = vector.load %arg8[%c1_27, %c0_28, %c0_29] : memref<2x4x128xf32, #tpu.memory_space<vmem>>, vector<1x4x128xf32>
    %73 = vector.shape_cast %72 : vector<1x4x128xf32> to vector<4x128xf32>
    %74 = vector.shape_cast %71 : vector<4x128xf32> to vector<1x4x128xf32>
    tpu.vector_store %arg8[%c1_27, %c0_28, %c0_29], %74 {strides = array<i32>} : memref<2x4x128xf32, #tpu.memory_space<vmem>>, vector<1x4x128xf32>,
    return
  }
  func.func @transform_0(%arg0: i32, %arg1: i32, %arg2: memref<2xi32, #tpu.memory_space<smem>>) -> (i32, i32, i32) {
    %c0_i32 = arith.constant 0 : i32
    %c0_i32_0 = arith.constant 0 : i32
    return %arg0, %arg1, %c0_i32 : i32, i32, i32
  }
  func.func @transform_1(%arg0: i32, %arg1: i32, %arg2: memref<2xi32, #tpu.memory_space<smem>>) -> (i32, i32) {
    %c0_i32 = arith.constant 0 : i32
    %c0_i32_0 = arith.constant 0 : i32
    %c0_i32_1 = arith.constant 0 : i32
    return %c0_i32, %c0_i32_0 : i32, i32
  }
  func.func @transform_2(%arg0: i32, %arg1: i32, %arg2: memref<2xi32, #tpu.memory_space<smem>>) -> (i32, i32) {
    %c0_i32 = arith.constant 0 : i32
    %c0_i32_0 = arith.constant 0 : i32
    %c0_i32_1 = arith.constant 0 : i32
    return %c0_i32, %c0_i32_0 : i32, i32
  }
  func.func @transform_3(%arg0: i32, %arg1: i32, %arg2: memref<2xi32, #tpu.memory_space<smem>>) -> (i32, i32) {
    %c0_i32 = arith.constant 0 : i32
    %c0_i32_0 = arith.constant 0 : i32
    %c0_i32_1 = arith.constant 0 : i32
    return %c0_i32, %c0_i32_0 : i32, i32
  }
  func.func @transform_4(%arg0: i32, %arg1: i32, %arg2: memref<2xi32, #tpu.memory_space<smem>>) -> i32 {
    %c0_i32 = arith.constant 0 : i32
    %c0_i32_0 = arith.constant 0 : i32
    return %c0_i32 : i32
  }
  func.func @transform_5(%arg0: i32, %arg1: i32, %arg2: memref<2xi32, #tpu.memory_space<smem>>) -> (i32, i32, i32) {
    %c0_i32 = arith.constant 0 : i32
    %c0_i32_0 = arith.constant 0 : i32
    return %arg0, %arg1, %c0_i32 : i32, i32, i32
  }
}

</mosaic_0001>

<bundles_post_ra>
// kernel: tpu_custom_call.1
= control target key start
LH: loop header
LB: loop body
LE: loop exit
PB: predicated region body
PF: predicated region fallthrough
CT: control target
= control target key end

     0   :  { %s888_s0 = inlined_call_operand.vmem [shape: s32[2], index: 0, kind: input, shape index: {}]   ;;  %s889_s1 = inlined_call_operand.vmem [shape: f32[2,4,128], index: 1, kind: input, shape index: {}]   ;;  %s890_s2 = inlined_call_operand.vmem [shape: f32[128,64], index: 2, kind: input, shape index: {}]   ;;  %s891_s3 = inlined_call_operand.vmem [shape: f32[1,64], index: 3, kind: input, shape index: {}]   ;;  %s892_s4 = inlined_call_operand.vmem [shape: f32[64,128], index: 4, kind: input, shape index: {}]   ;;  %s893_s5 = inlined_call_operand.<no memory space> [shape: f32[1], index: 5, kind: input, shape index: {}]   ;;  %s894_s6 = inlined_call_operand.hbm [shape: f32[2,4,128], index: 6, kind: output, shape index: {}]  }
   0x1   :  { %s11_s23 = sshll.u32 %s888_s0, 4  ;;  %s12_s23 = int_to_ptr.vmem [resolvable:$true] %s11_s23 }
   0x2   :  { %s663_s24 = scalar_lea.vmem %s12_s23, 16  ;;  %p668_p1 = scmp.lt.s32.totalorder %s12_s23, %s12_s23 }
   0x3   :  { %p664_p0 = scmp.ne.s32.totalorder %s12_s23, %s663_s24  ;;  %p669_p2 = scmp.lt.s32.totalorder %s663_s24, %s663_s24 }
   0x5   :  { %p670_p3 = por %p669_p2, %p668_p1 }
   0x7   :  { %p671_p4 = pnand %p670_p3, %p664_p0 }
   0x9   :  { %674 = shalt.err (!%p671_p4)  }
   0xa   :  { %s701_s25 = smov [#allocation3]  }
   0xb   :  { %14 = dma.vmem_to_smem %s12_s23, 16, %s701_s25, [#allocation2] }
   0xc   :  { %697 = dma.done.wait [#allocation2], 16 }
   0xd   :  { %698 = vsyncadd [#allocation2], 4294967280 }
   0xe   :  { %17 = sfence }
   0xf   :  { %v29_v0 = vld [vmem:[%s890_s2] sm:$0xff]  ;;  %v30_v1 = vld [vmem:[%s890_s2 + $0x8] sm:$0xff]  ;;  %v31_v2 = vld [vmem:[%s890_s2 + $0x10] sm:$0xff]  ;;  %v702_v3 = vmov 0.0|0.0   ;;  %vm703_vm0 = vmmov 0   ;;  %v704_v6 = vmov 0.0  }
  0x10   :  { %576 = vmatprep.subr.bf16.mxu0 %v702_v3  ;;  %v756_v4 = vpack.c.bf16 %v30_v1, %v29_v0  ;;  %v32_v5 = vld [vmem:[%s890_s2 + $0x18] sm:$0xff]  ;;  %500 = vmatprep.mubr.msk.f32.mxu0 %vm703_vm0, %v704_v6  ;;  %v33_v8 = vld [vmem:[%s890_s2 + $0x20] sm:$0xff]  ;;  %v34_v9 = vld [vmem:[%s890_s2 + $0x28] sm:$0xff] }
  0x11   :  { %600 = vmatprep.subr.bf16.mxu1 %v702_v3  ;;  %519 = vmatprep.mubr.msk.f32.mxu1 %vm703_vm0, %v704_v6  ;;  %v767_v7 = vpack.c.bf16 %v32_v5, %v31_v2  ;;  %v46_v10 = vld [vmem:[%s892_s4] sm:$0xff]  ;;  %v47_v11 = vld [vmem:[%s892_s4 + $0x8] sm:$0xff]  ;;  %v48_v12 = vld [vmem:[%s892_s4 + $0x10] sm:$0xff]  ;;  %v789_v14 = vpack.c.bf16 %v34_v9, %v33_v8 }
  0x12   :  { %578 = vmatpush3.bf16.msra.mxu0 %v756_v4  ;;  %v49_v13 = vld [vmem:[%s892_s4 + $0x18] sm:$0xff]  ;;  %v601_v15 = vpack.c.bf16 %v47_v11, %v46_v10  ;;  %v35_v16 = vld [vmem:[%s890_s2 + $0x30] sm:$0xff] }
  0x13   :  { %579 = vmatprep.subr.bf16.mxu0 %v702_v3  ;;  %v36_v17 = vld [vmem:[%s890_s2 + $0x38] sm:$0xff] }
  0x16   :  { %581 = vmatpush3.bf16.msra.mxu0 %v767_v7 }
  0x17   :  { %582 = vmatprep.subr.bf16.mxu0 %v702_v3 }
  0x18   :  { %18 = vsyncpa [#allocation6], 0  ;;  %602 = vmatpush3.bf16.msra.mxu1 %v601_v15  ;;  %v604_v18 = vpack.c.bf16 %v49_v13, %v48_v12  ;;  %v50_v19 = vld [vmem:[%s892_s4 + $0x20] sm:$0xff]  ;;  %v51_v20 = vld [vmem:[%s892_s4 + $0x28] sm:$0xff]  ;;  %v586_v21 = vpack.c.bf16 %v36_v17, %v35_v16  ;;  %vm139_vm1 = vcmask 523264   ;;  %v138_v45 = vstv %s893_s5  ;;  %s220_s29 = sld [smem:[#allocation3]] }
  0x19   :  { %603 = vmatprep.subr.bf16.mxu1 %v702_v3  ;;  %v37_v22 = vld [vmem:[%s890_s2 + $0x40] sm:$0xff]  ;;  %v38_v23 = vld [vmem:[%s890_s2 + $0x48] sm:$0xff]  ;;  %v607_v24 = vpack.c.bf16 %v51_v20, %v50_v19  ;;  %v39_v26 = vld [vmem:[%s890_s2 + $0x50] sm:$0xff]  ;;  %v55_v50 = vlaneseq  ;;  %s705_s5 = smov [#allocation5]  }
  0x1a   :  { %584 = vmatpush3.bf16.msra.mxu0 %v789_v14  ;;  %v589_v25 = vpack.c.bf16 %v38_v23, %v37_v22  ;;  %v40_v27 = vld [vmem:[%s890_s2 + $0x58] sm:$0xff]  ;;  %v41_v29 = vld [vmem:[%s890_s2 + $0x60] sm:$0xff]  ;;  %v42_v30 = vld [vmem:[%s890_s2 + $0x68] sm:$0xff]  ;;  %s398_s0 = sshll.u32 %s705_s5, 4  ;;  %s399_s0 = int_to_ptr.vmem [resolvable:$true] %s398_s0 }
  0x1b   :  { %585 = vmatprep.subr.bf16.mxu0 %v702_v3  ;;  %v592_v28 = vpack.c.bf16 %v40_v27, %v39_v26  ;;  %v595_v31 = vpack.c.bf16 %v42_v30, %v41_v29  ;;  %v43_v32 = vld [vmem:[%s890_s2 + $0x70] sm:$0xff]  ;;  %v44_v33 = vld [vmem:[%s890_s2 + $0x78] sm:$0xff]  ;;  %v60_v35 = vld [vmem:[%s889_s1] sm:$0xf]  ;;  %v58_v51 = vshrl.u32 %v55_v50, 7  ;;  %v56_v57 = vand.u32 127, %v55_v50  ;;  %p680_p6 = scmp.lt.s32.totalorder %s399_s0, %s399_s0 }
  0x1c   :  { %605 = vmatpush3.bf16.msra.mxu1 %v604_v18  ;;  %v598_v34 = vpack.c.bf16 %v44_v33, %v43_v32  ;;  %v52_v36 = vld [vmem:[%s892_s4 + $0x30] sm:$0xff]  ;;  %v53_v37 = vld [vmem:[%s892_s4 + $0x38] sm:$0xff]  ;;  %v409_v39 = vld [vmem:[%s891_s3] ss:$0 sm:$0xff]  ;;  %s675_s30 = scalar_lea.vmem %s399_s0, 128 }
  0x1d   :  { %606 = vmatprep.subr.bf16.mxu1 %v702_v3  ;;  %v610_v38 = vpack.c.bf16 %v53_v37, %v52_v36  ;;  %v412_v44 = vld [vmem:[%s889_s1 + $0x4] sm:$0xf]  ;;  %v223_v52 = vmul.u32 2, %v58_v51  ;;  %s415_s1 = sld [smem:[#allocation3 + $0x1]]  ;;  %p676_p5 = scmp.ne.s32.totalorder %s399_s0, %s675_s30 }
  0x1e   :  { %587 = vmatpush3.bf16.msra.mxu0 %v586_v21  ;;  %v224_v54 = vstv %s220_s29  ;;  %p681_p7 = scmp.lt.s32.totalorder %s675_s30, %s675_s30 }
  0x1f   :  { %588 = vmatprep.subr.bf16.mxu0 %v702_v3  ;;  %v225_v56 = vsub.s32 %v224_v54, %v223_v52 }
  0x20   :  { %608 = vmatpush3.bf16.msra.mxu1 %v607_v24  ;;  %p682_p8 = por %p681_p7, %p680_p6 }
  0x21   :  { %609 = vmatprep.subr.bf16.mxu1 %v702_v3  ;;  %v226_v58 = vmul.u32 64, %v225_v56 }
  0x22   :  { %590 = vmatpush3.bf16.msra.mxu0 %v589_v25  ;;  %p683_p9 = pnand %p682_p8, %p676_p5 }
  0x23   :  { %591 = vmatprep.subr.bf16.mxu0 %v702_v3  ;;  %vm227_vm2 = vcmp.lt.s32.totalorder %v56_v57, %v226_v58 }
  0x24   :  { %611 = vmatpush3.bf16.msra.mxu1 %v610_v38 }
  0x25   :  { %612 = vmatprep.subr.bf16.mxu1 %v702_v3 }
  0x26   :  { %593 = vmatpush3.bf16.msra.mxu0 %v592_v28 }
  0x27   :  { %594 = vmatprep.subr.bf16.mxu0 %v702_v3 }
  0x2a   :  { %596 = vmatpush3.bf16.msra.mxu0 %v595_v31 }
  0x2b   :  { %597 = vmatprep.subr.bf16.mxu0 %v702_v3 }
  0x2e   :  { %599 = vmatpush3.bf16.msra.mxu0 %v598_v34 }
  0x2f   :  { %636 = vmatprep.subr.bf16.mxu0 %v702_v3 }
  0x31   :  { %501 = vmatmul.mubr.f32.vlgmr.msra.gmra.mrb[0].mxu0 %v60_v35 }
  0x32   :  { %638 = vmatpush3.bf16.msra.mxu0 %v601_v15  ;;  %573 = vmatprep.mubr.msk.f32.mxu0 %vm703_vm0, %v704_v6 }
  0x33   :  { %639 = vmatprep.subr.bf16.mxu0 %v702_v3 }
  0x36   :  { %641 = vmatpush3.bf16.msra.mxu0 %v604_v18 }
  0x37   :  { %642 = vmatprep.subr.bf16.mxu0 %v702_v3 }
  0x3a   :  { %644 = vmatpush3.bf16.msra.mxu0 %v607_v24 }
  0x3b   :  { %645 = vmatprep.subr.bf16.mxu0 %v702_v3 }
  0x3e   :  { %647 = vmatpush3.bf16.msra.mxu0 %v610_v38 }
 0x104   :  { %v133_v40 = vpop.f32.mrb[0].mxu0 }
 0x105   :  { %v134_v41 = vadd.f32 %v409_v39, %v133_v40  ;;  %v502_v42 = vpop.f32.mrb[1].mxu0 }
 0x107   :  { %v137_v43 = vmax.f32 %v134_v41, 0.0 }
 0x109   :  { %520 = vmatmul.mubr.msk.f32.vlgmr.msra.gmra.mrb[0].mxu1 %vm139_vm1, %v137_v43 }
 0x10a   :  { %614 = vmatpush3.bf16.msra.mxu1 %v756_v4  ;;  %554 = vmatprep.mubr.msk.f32.mxu1 %vm703_vm0, %v704_v6 }
 0x10b   :  { %615 = vmatprep.subr.bf16.mxu1 %v702_v3 }
 0x10e   :  { %617 = vmatpush3.bf16.msra.mxu1 %v767_v7  ;;  %v385_v7 = vstv %s415_s1 }
 0x10f   :  { %618 = vmatprep.subr.bf16.mxu1 %v702_v3  ;;  %v386_v9 = vsub.s32 %v385_v7, %v223_v52 }
 0x111   :  { %v387_v10 = vmul.u32 64, %v386_v9 }
 0x112   :  { %620 = vmatpush3.bf16.msra.mxu1 %v789_v14 }
 0x113   :  { %621 = vmatprep.subr.bf16.mxu1 %v702_v3  ;;  %vm388_vm3 = vcmp.lt.s32.totalorder %v56_v57, %v387_v10 }
 0x116   :  { %623 = vmatpush3.bf16.msra.mxu1 %v586_v21 }
 0x117   :  { %624 = vmatprep.subr.bf16.mxu1 %v702_v3 }
 0x11a   :  { %626 = vmatpush3.bf16.msra.mxu1 %v589_v25 }
 0x11b   :  { %627 = vmatprep.subr.bf16.mxu1 %v702_v3 }
 0x11e   :  { %629 = vmatpush3.bf16.msra.mxu1 %v592_v28 }
 0x11f   :  { %630 = vmatprep.subr.bf16.mxu1 %v702_v3 }
 0x122   :  { %632 = vmatpush3.bf16.msra.mxu1 %v595_v31 }
 0x123   :  { %633 = vmatprep.subr.bf16.mxu1 %v702_v3 }
 0x126   :  { %635 = vmatpush3.bf16.msra.mxu1 %v598_v34 }
 0x129   :  { %555 = vmatmul.mubr.f32.vlgmr.msra.gmra.mrb[2].mxu1 %v412_v44 }
 0x1dc   :  { %v209_v46 = vpop.f32.mrb[0].mxu1 }
 0x1dd   :  { %v210_v47 = vadd.f32 %v209_v46, %v138_v45  ;;  %v521_v48 = vpop.f32.mrb[1].mxu1 }
 0x1df   :  { %v411_v49 = vmul.f32 -1.442695, %v210_v47 }
 0x1e1   :  { %655 = vpow2.f32 %v411_v49 }
 0x1eb   :  { %v656_v53 = vpop.eup %655 }
 0x1ec   :  { %v216_v55 = vadd.f32 1.0, %v656_v53 }
 0x1ee   :  { %657 = vrcp.f32 %v216_v55 }
 0x1f8   :  { %v658_v59 = vpop.eup %657 }
 0x1f9   :  { %v228_v60 = vsel %vm227_vm2, %v658_v59, 0.0 }
 0x1fa   :  { %v229_v61 = vmul.f32 %v228_v60, %v60_v35 }
 0x1fc   :  { %v299_v62 = vpop.f32.mrb[2].mxu1  ;;  %230 = vst [vmem:[#allocation5] sm:$0xf] %v229_v61 }
 0x1fd   :  { %v300_v63 = vadd.f32 %v409_v39, %v299_v62  ;;  %v556_v0 = vpop.f32.mrb[3].mxu1 }
 0x1ff   :  { %v303_v1 = vmax.f32 %v300_v63, 0.0 }
 0x201   :  { %574 = vmatmul.mubr.msk.f32.vlgmr.msra.gmra.mrb[2].mxu0 %vm139_vm1, %v303_v1 }
 0x2d4   :  { %v373_v2 = vpop.f32.mrb[2].mxu0 }
 0x2d5   :  { %v374_v3 = vadd.f32 %v373_v2, %v138_v45  ;;  %v575_v4 = vpop.f32.mrb[3].mxu0 }
 0x2d7   :  { %v414_v5 = vmul.f32 -1.442695, %v374_v3 }
 0x2d9   :  { %659 = vpow2.f32 %v414_v5 }
 0x2e3   :  { %v660_v6 = vpop.eup %659 }
 0x2e4   :  { %v380_v8 = vadd.f32 1.0, %v660_v6 }
 0x2e6   :  { %661 = vrcp.f32 %v380_v8 }
 0x2f0   :  { %v662_v11 = vpop.eup %661 }
 0x2f1   :  { %v389_v12 = vsel %vm388_vm3, %v662_v11, 0.0 }
 0x2f2   :  { %v390_v13 = vmul.f32 %v412_v44, %v389_v12 }
 0x2f4   :  { %392 = vst [vmem:[#allocation5 + $0x4] sm:$0xf] %v390_v13 }
 0x2f5   :  { %686 = shalt.err (!%p683_p9)
}
 0x2f6   :  { %s687_s9 = scalar_lea.hbm %s894_s6, 128 }
 0x2f7   :  { %p688_p10 = scmp.ne.s32.totalorder %s894_s6, %s687_s9  ;;  %p691_p11 = scmp.lt.u32.totalorder %s687_s9, %s894_s6 }
 0x2f9   :  { %p693_p12 = pnand %p691_p11, %p688_p10 }
 0x2fb   :  { %696 = shalt.err (!%p693_p12)
}
 0x2fc   :  { %s706_s14 = smov 64   ;;  %s707_s15 = smov 4  }
 0x2fd   :  { %404 = dma.vmem_to_hbm [thread:$0]  %s399_s0, 128, %s894_s6, [#allocation6], %s706_s14, %s706_s14, %s707_s15  }
 0x2fe   :  { %699 = dma.done.wait [#allocation6], 128  }
 0x2ff   :  { %700 = vsyncadd [#allocation6], 4294967168 }
 0x300   :  { %408 = vsyncpa [#allocation6], 1 }

</bundles_post_ra>
